<compile_context>
chip_gen: v5e
topology: v5e:2x2
jax: 0.10.0
libtpu: 0.0.40
codegen_flags: <defaults>
</compile_context>

<pallas_src>
import functools

import jax
import jax.numpy as jnp
from jax.experimental import pallas as pl
from jax.experimental.pallas import tpu as pltpu


def _smallnn_kernel(x_ref, w1_ref, b1_ref, w2_ref, b2_ref, o_ref, *, act_dtype):
    # x_ref : (4, TB)   f32  feature-major input tile (lane-dense, streamed)
    # w1_ref: (16, 4)   f32  fc1.weight (torch layout: out_features x in_features)
    # b1_ref: (16, 1)   f32  fc1.bias as a column (broadcasts across lanes)
    # w2_ref: (1, 16)   f32  fc2.weight
    # b2_ref: (1, 1)    f32  fc2.bias (SMEM scalar)
    # o_ref : (1, TB)   f32  lane-dense output tile
    z = jnp.dot(w1_ref[...], x_ref[...], preferred_element_type=jnp.float32)
    z = z + b1_ref[...]                                    # (16, TB) f32

    # sigmoid(z) = 0.5 * tanh(0.5 * z) + 0.5  -> one EUP op (no exp + divide).
    za = (z * 0.5).astype(act_dtype)
    h = jnp.tanh(za) * 0.5 + 0.5                           # (16, TB) act_dtype

    # Second layer: (1, 16) @ (16, TB) -> (1, TB), f32 accumulation on the MXU.
    y = jnp.dot(w2_ref[...].astype(act_dtype), h,
                preferred_element_type=jnp.float32)
    o_ref[...] = (y + b2_ref[0, 0]).astype(o_ref.dtype)


def _default_act_dtype():
    """bf16 transcendentals on v6e/v7x (bf16 EUP/VPU); f32 on v5e and older."""
    try:
        kind = jax.devices()[0].device_kind.lower()
    except Exception:
        return jnp.float32
    if ("v6" in kind) or ("v7" in kind) or ("7x" in kind):
        return jnp.bfloat16
    return jnp.float32


@functools.partial(jax.jit, static_argnames=("block_b", "act_dtype"))
def smallnn_fhd_v2(x, w1, b1, w2, b2, *, block_b=65536, act_dtype=None):
    """x: (B, 4) f32 -> (B, 1) f32.

    w1: (16, 4) fc1.weight   b1: (16,) fc1.bias
    w2: (1, 16) fc2.weight   b2: (1,)  fc2.bias
    """
    if act_dtype is None:
        act_dtype = _default_act_dtype()

    B, f_in = x.shape
    f_hid = w1.shape[0]

    # Batch tile: multiple of 128 (lane-dense blocks), capped at block_b.
    block_b = max(128, (int(block_b) // 128) * 128)
    tb = min(block_b, pl.cdiv(max(B, 1), 128) * 128)
    grid_b = pl.cdiv(B, tb)          # ragged tail -> partial final block (no pad)

    xt = x.T                         # (4, B) feature-major, lane-dense input
    b1_col = b1.reshape(f_hid, 1)    # (16, 1)
    b2_sc = b2.reshape(1, 1)         # (1, 1) -> SMEM scalar

    # VMEM budget per core: 2x (4,tb) x-buffers + 2x (1,tb) out-buffers
    # + (16,tb) h temporary + resident weights  ~= 100*tb bytes  << 48 MiB.
    out = pl.pallas_call(
        functools.partial(_smallnn_kernel, act_dtype=act_dtype),
        out_shape=jax.ShapeDtypeStruct((1, B), jnp.float32),
        grid=(grid_b,),
        in_specs=[
            pl.BlockSpec((f_in, tb), lambda i: (0, i)),          # x (streamed)
            pl.BlockSpec((f_hid, f_in), lambda i: (0, 0)),       # W1 (resident)
            pl.BlockSpec((f_hid, 1), lambda i: (0, 0)),          # b1 (resident)
            pl.BlockSpec((1, f_hid), lambda i: (0, 0)),          # W2 (resident)
            pl.BlockSpec(memory_space=pltpu.MemorySpace.SMEM),   # b2 scalar
        ],
        out_specs=pl.BlockSpec((1, tb), lambda i: (0, i)),       # lane-dense out
        compiler_params=pltpu.CompilerParams(
            dimension_semantics=("parallel",),
            vmem_limit_bytes=48 * 1024 * 1024,   # safe on v7x (64 MiB physical)
        ),
    )(xt, w1, b1_col, w2, b2_sc)

    return out.reshape(B, 1)         # (1, B) -> (B, 1) is a free reshape


def init_params(key):
    """Deterministic init matching the nn.Module's parameter shapes."""
    d = 4
    total_clients = 4
    k1, k2, k3, k4 = jax.random.split(key, 4)
    # fc1: Linear(4, 16) -> weight (16, 4), bias (16,)
    bound1 = 1.0 / jnp.sqrt(total_clients)
    w1 = jax.random.uniform(k1, (total_clients * d, total_clients),
                            minval=-bound1, maxval=bound1, dtype=jnp.float32)
    b1 = jax.random.uniform(k2, (total_clients * d,),
                            minval=-bound1, maxval=bound1, dtype=jnp.float32)
    # fc2: Linear(16, 1) -> weight (1, 16), bias (1,)
    bound2 = 1.0 / jnp.sqrt(total_clients * d)
    w2 = jax.random.uniform(k3, (1, total_clients * d),
                            minval=-bound2, maxval=bound2, dtype=jnp.float32)
    b2 = jax.random.uniform(k4, (1,),
                            minval=-bound2, maxval=bound2, dtype=jnp.float32)
    return w1, b1, w2, b2


def reference(x, w1, b1, w2, b2):
    h = jax.nn.sigmoid(x @ w1.T + b1)
    return h @ w2.T + b2


if __name__ == "__main__":
    key = jax.random.PRNGKey(0)
    kx1, kx2, kx3, kp = jax.random.split(key, 4)
    w1, b1, w2, b2 = init_params(kp)

    act = _default_act_dtype()
    auto_tol = (dict(atol=2e-5, rtol=2e-5) if act == jnp.float32
                else dict(atol=5e-2, rtol=5e-2))   # bf16 activations on v6e/v7x

    # 1) Small batch, default (auto) activation dtype, single partial tile.
    B = 8
    x = jax.random.normal(kx1, (B, 4), dtype=jnp.float32)
    out = jax.block_until_ready(smallnn_fhd_v2(x, w1, b1, w2, b2))
    ref = reference(x, w1, b1, w2, b2)
    assert out.shape == (B, 1), out.shape
    assert jnp.allclose(out, ref, **auto_tol), (out, ref)

    # 2) Same batch, forced f32 activations -> tight tolerance on every chip.
    out_f32 = jax.block_until_ready(
        smallnn_fhd_v2(x, w1, b1, w2, b2, act_dtype=jnp.float32))
    assert jnp.allclose(out_f32, ref, atol=2e-5, rtol=2e-5), (out_f32, ref)

    # 3) Multi-tile + ragged tail: grid of 3 steps, last block partial, no pad.
    B2 = 300
    x2 = jax.random.normal(kx2, (B2, 4), dtype=jnp.float32)
    out2 = jax.block_until_ready(
        smallnn_fhd_v2(x2, w1, b1, w2, b2, block_b=128, act_dtype=jnp.float32))
    ref2 = reference(x2, w1, b1, w2, b2)
    assert out2.shape == (B2, 1), out2.shape
    assert jnp.allclose(out2, ref2, atol=2e-5, rtol=2e-5), (out2, ref2)

    # 4) Large batch on the default 64K-row tile (several grid steps + tail).
    B3 = 200_000
    x3 = jax.random.normal(kx3, (B3, 4), dtype=jnp.float32)
    out3 = jax.block_until_ready(smallnn_fhd_v2(x3, w1, b1, w2, b2))
    ref3 = reference(x3, w1, b1, w2, b2)
    assert out3.shape == (B3, 1), out3.shape
    assert jnp.allclose(out3, ref3, **auto_tol)

    print("KERNEL_OK")
</pallas_src>

<mosaic_0001>
module attributes {stable_mosaic.version = 11 : i64} {
  func.func @_smallnn_kernel(%arg0: i32, %arg1: memref<4x128xf32, #tpu.memory_space<vmem>>, %arg2: memref<16x4xf32, #tpu.memory_space<vmem>>, %arg3: memref<16x1xf32, #tpu.memory_space<vmem>>, %arg4: memref<1x16xf32, #tpu.memory_space<vmem>>, %arg5: memref<1x1xf32, #tpu.memory_space<smem>>, %arg6: memref<1x128xf32, #tpu.memory_space<vmem>>) attributes {dimension_semantics = [#tpu.dimension_semantics<parallel>], iteration_bounds = array<i64: 1>, scalar_prefetch = 0 : i64, scratch_operands = 0 : i64, tpu.core_type = #tpu.core_type<tc>, window_params = [{transform_indices = @transform_0, window_bounds = array<i64: 4, 128>}, {pipeline_mode = #tpu.pipeline_mode<synchronous>, transform_indices = @transform_1, window_bounds = array<i64: 16, 4>}, {pipeline_mode = #tpu.pipeline_mode<synchronous>, transform_indices = @transform_2, window_bounds = array<i64: 16, 1>}, {pipeline_mode = #tpu.pipeline_mode<synchronous>, transform_indices = @transform_3, window_bounds = array<i64: 1, 16>}, {transform_indices = @transform_4, window_bounds = array<i64: 1, 1>}, {transform_indices = @transform_5, window_bounds = array<i64: 1, 128>}]} {
    %c0 = arith.constant 0 : index
    %c0_0 = arith.constant 0 : index
    %0 = vector.load %arg2[%c0, %c0_0] : memref<16x4xf32, #tpu.memory_space<vmem>>, vector<16x4xf32>
    %c0_1 = arith.constant 0 : index
    %c0_2 = arith.constant 0 : index
    %1 = vector.load %arg1[%c0_1, %c0_2] : memref<4x128xf32, #tpu.memory_space<vmem>>, vector<4x128xf32>
    %cst = arith.constant dense<0.000000e+00> : vector<16x128xf32>
    %2 = tpu.matmul %0, %1, %cst {dimension_numbers = #tpu.dot_dimension_numbers<[1], [0], [0], [1], [0, 0, 1, 1], [], []>} : vector<16x4xf32>, vector<4x128xf32>, vector<16x128xf32> -> vector<16x128xf32>
    %c0_3 = arith.constant 0 : index
    %c0_4 = arith.constant 0 : index
    %3 = vector.load %arg3[%c0_3, %c0_4] : memref<16x1xf32, #tpu.memory_space<vmem>>, vector<16x1xf32>
    %4 = vector.broadcast %3 : vector<16x1xf32> to vector<16x128xf32>
    %5 = arith.addf %2, %4 : vector<16x128xf32>
    %cst_5 = arith.constant 5.000000e-01 : f32
    %6 = vector.broadcast %cst_5 : f32 to vector<16x128xf32>
    %7 = arith.mulf %5, %6 : vector<16x128xf32>
    %8 = math.tanh %7 : vector<16x128xf32>
    %cst_6 = arith.constant 5.000000e-01 : f32
    %9 = vector.broadcast %cst_6 : f32 to vector<16x128xf32>
    %10 = arith.mulf %8, %9 : vector<16x128xf32>
    %cst_7 = arith.constant 5.000000e-01 : f32
    %11 = vector.broadcast %cst_7 : f32 to vector<16x128xf32>
    %12 = arith.addf %10, %11 : vector<16x128xf32>
    %c0_8 = arith.constant 0 : index
    %c0_9 = arith.constant 0 : index
    %13 = vector.load %arg4[%c0_8, %c0_9] : memref<1x16xf32, #tpu.memory_space<vmem>>, vector<1x16xf32>
    %cst_10 = arith.constant dense<0.000000e+00> : vector<1x128xf32>
    %14 = tpu.matmul %13, %12, %cst_10 {dimension_numbers = #tpu.dot_dimension_numbers<[1], [0], [0], [1], [0, 0, 1, 1], [], []>} : vector<1x16xf32>, vector<16x128xf32>, vector<1x128xf32> -> vector<1x128xf32>
    %c0_11 = arith.constant 0 : index
    %c0_12 = arith.constant 0 : index
    %15 = memref.load %arg5[%c0_11, %c0_12] : memref<1x1xf32, #tpu.memory_space<smem>>
    %16 = vector.broadcast %15 : f32 to vector<1x128xf32>
    %17 = arith.addf %14, %16 : vector<1x128xf32>
    %c0_13 = arith.constant 0 : index
    %c0_14 = arith.constant 0 : index
    %18 = vector.load %arg6[%c0_13, %c0_14] : memref<1x128xf32, #tpu.memory_space<vmem>>, vector<1x128xf32>
    tpu.vector_store %arg6[%c0_13, %c0_14], %17 {strides = array<i32>} : memref<1x128xf32, #tpu.memory_space<vmem>>, vector<1x128xf32>,
    return
  }
  func.func @transform_0(%arg0: i32) -> (i32, i32) {
    %c0_i32 = arith.constant 0 : i32
    %c0_i32_0 = arith.constant 0 : i32
    return %c0_i32, %arg0 : i32, i32
  }
  func.func @transform_1(%arg0: i32) -> (i32, i32) {
    %c0_i32 = arith.constant 0 : i32
    %c0_i32_0 = arith.constant 0 : i32
    %c0_i32_1 = arith.constant 0 : i32
    return %c0_i32, %c0_i32_0 : i32, i32
  }
  func.func @transform_2(%arg0: i32) -> (i32, i32) {
    %c0_i32 = arith.constant 0 : i32
    %c0_i32_0 = arith.constant 0 : i32
    %c0_i32_1 = arith.constant 0 : i32
    return %c0_i32, %c0_i32_0 : i32, i32
  }
  func.func @transform_3(%arg0: i32) -> (i32, i32) {
    %c0_i32 = arith.constant 0 : i32
    %c0_i32_0 = arith.constant 0 : i32
    %c0_i32_1 = arith.constant 0 : i32
    return %c0_i32, %c0_i32_0 : i32, i32
  }
  func.func @transform_4(%arg0: i32) -> (i32, i32) {
    %c0_i32 = arith.constant 0 : i32
    %c0_i32_0 = arith.constant 0 : i32
    %c0_i32_1 = arith.constant 0 : i32
    return %c0_i32, %c0_i32_0 : i32, i32
  }
  func.func @transform_5(%arg0: i32) -> (i32, i32) {
    %c0_i32 = arith.constant 0 : i32
    %c0_i32_0 = arith.constant 0 : i32
    return %c0_i32, %arg0 : i32, i32
  }
}

</mosaic_0001>

<bundles_post_ra>
// kernel: smallnn_fhd_v2.1
= control target key start
LH: loop header
LB: loop body
LE: loop exit
PB: predicated region body
PF: predicated region fallthrough
CT: control target
= control target key end

     0   :  { %vm44_vm0 = vcmask 1043456   ;;  %vm37_vm1 = vcmask 31744   ;;  %s217_s0 = inlined_call_operand.vmem [shape: f32[4,8], index: 0, kind: input, shape index: {}]   ;;  %s218_s1 = inlined_call_operand.vmem [shape: f32[16,4], index: 1, kind: input, shape index: {}]   ;;  %s219_s2 = inlined_call_operand.vmem [shape: f32[16,1], index: 2, kind: input, shape index: {}]   ;;  %s220_s3 = inlined_call_operand.vmem [shape: f32[1,16], index: 3, kind: input, shape index: {}]   ;;  %s221_s4 = inlined_call_operand.<no memory space> [shape: f32[1,1], index: 4, kind: input, shape index: {}]   ;;  %s222_s5 = inlined_call_operand.hbm [shape: f32[1,8], index: 5, kind: output, shape index: {}]  }
   0x1   :  { %v24_v0 = vld [vmem:[%s217_s0] sm:$0xf]  ;;  %v23_v2 = vld [vmem:[%s218_s1 + $0x8] sm:$0xff] }
   0x2   :  { %v22_v1 = vld [vmem:[%s218_s1] sm:$0xff]  ;;  %123 = vmatpush.msk.msra.mxu0 %vm44_vm0, %v24_v0  ;;  %127 = vmatpush.msk.msra.mxu2 %vm44_vm0, %v24_v0  ;;  %v26_v3 = vld [vmem:[%s219_s2 + $0x8] sm:$0xff] }
   0x3   :  { %11 = vsyncpa [#allocation4], 0  ;;  %124 = vmatmul.msk.f32.vlgmr.msra.gmra.mxu0 %vm37_vm1, %v22_v1  ;;  %125 = vmatmul.msk.f32.vlgmr.msra.gmra.mxu2 %vm37_vm1, %v23_v2  ;;  %v161_v4 = vmov 0   ;;  %v25_v5 = vld [vmem:[%s219_s2] sm:$0xff]  ;;  %vm82_vm2 = vcmask 130048   ;;  %v81_v21 = vstv %s221_s4  ;;  %s162_s29 = smov [#allocation3]  }
   0x4   :  { %130 = vset.pattern.permute.xlu0 %v161_v4  ;;  %v79_v20 = vld [vmem:[%s220_s3] sm:$0x1]  ;;  %s112_s30 = sshll.u32 %s162_s29, 4  ;;  %s114_s8 = sshll.u32 %s222_s5, 4  ;;  %s113_s30 = int_to_ptr.vmem [resolvable:$true] %s112_s30  ;;  %s115_s8 = int_to_ptr.hbm [resolvable:$true] %s114_s8 }
   0x5   :  { %34 = vperm.xlu0 %130, %v26_v3  }
   0xd   :  { %29 = vperm.xlu0 %130, %v25_v5  }
  0x77   :  { %v35_v6 = vpop.permute.xlu0 %34 }
  0x7f   :  { %v30_v7 = vpop.permute.xlu0 %29 }
  0x80   :  { %v65_v8 = vpop.f32.mrf.mxu0 }
  0x81   :  { %v66_v9 = vadd.f32 %v65_v8, %v30_v7 }
  0x83   :  { %v71_v10 = vmul.f32 0.5, %v66_v9 }
  0x85   :  { %131 = vtanh.f32 %v71_v10 }
  0x86   :  { %v68_v11 = vpop.f32.mrf.mxu2 }
  0x87   :  { %v69_v12 = vadd.f32 %v68_v11, %v35_v6 }
  0x89   :  { %v72_v13 = vmul.f32 0.5, %v69_v12 }
  0x8b   :  { %133 = vtanh.f32 %v72_v13  ;;  %v132_v14 = vpop.eup %131 }
  0x8c   :  { %v75_v17 = vmul.f32 0.5, %v132_v14 }
  0x8e   :  { %v77_v19 = vadd.f32 0.5, %v75_v17 }
  0x91   :  { %v134_v15 = vpop.eup %133 }
  0x92   :  { %v76_v16 = vmul.f32 0.5, %v134_v15 }
  0x94   :  { %v78_v18 = vadd.f32 0.5, %v76_v16 }
  0x96   :  { %100 = vmatpush.msra.mxu1 %v78_v18 }
  0x98   :  { %101 = vmatpush.msra.mxu1 %v77_v19 }
  0x99   :  { %126 = vmatmul.msk.f32.vlgmr.msra.gmra.mxu1 %vm82_vm2, %v79_v20 }
 0x116   :  { %v103_v22 = vpop.f32.mrf.mxu1 }
 0x117   :  { %v104_v23 = vadd.f32 %v103_v22, %v81_v21 }
 0x119   :  { %106 = vst [vmem:[#allocation3] sm:$0x1] %v104_v23 }
 0x11a   :  { %117 = dma.vmem_to_hbm [thread:$0]  %s113_s30, 16, %s115_s8, [#allocation4]  }
 0x11b   :  { %159 = dma.done.wait [#allocation4], 16  }
 0x11c   :  { %160 = vsyncadd [#allocation4], 4294967280 }
 0x11d   :  { %122 = vsyncpa [#allocation4], 1 }

</bundles_post_ra>
